<compile_context>
chip_gen: v7x
topology: tpu7x:2x2x1
jax: 0.10.0
libtpu: 0.0.40
codegen_flags: <defaults>
</compile_context>

<pallas_src>
from collections import namedtuple

import jax
import jax.numpy as jnp
from jax.experimental import pallas as pl
from jax.experimental.pallas import tpu as pltpu


# ---------------------------------------------------------------------------
# ShapeSpec — identical semantics to the PyTorch namedtuple subclass.
# ---------------------------------------------------------------------------
class ShapeSpec(namedtuple("_ShapeSpec", ["channels", "height", "width", "stride"])):
    def __new__(cls, channels=None, height=None, width=None, stride=None):
        return super().__new__(cls, channels, height, width, stride)


# ---------------------------------------------------------------------------
# Pallas kernel: identity pass-through (the hot path of the abstract forward).
# ---------------------------------------------------------------------------
def _copy_kernel(x_ref, o_ref):
    o_ref[...] = x_ref[...]


_LANE = 128
# ~2 MiB per tile buffer -> ~8 MiB resident once double-buffered for in + out.
# Fits every generation's scoped-VMEM default (v5e 16 MiB, v6e/v7x 32 MiB).
_TARGET_TILE_BYTES = 2 * 1024 * 1024


def _pick_lane_cols(total, last_dim):
    """Largest lane-dense column width (multiple of 128, up to 4096) dividing
    `total`; ragged totals keep the original last dim (full-extent lane block
    is always legal)."""
    for c in (4096, 2048, 1024, 512, 256, _LANE):
        if total % c == 0:
            return c
    # Ragged: total is not a multiple of 128.  Use the original trailing dim
    # (it always divides total) so the lane dim is a full-extent block.
    return max(1, last_dim)


def _pick_tile_rows(rows, cols, itemsize):
    """Row-tile size near the ~2 MiB target, dtype-aware sublane multiple."""
    # Packed dtypes need bigger sublane multiples: 8 (f32), 16 (bf16), 32 (i8).
    min_rows = max(8, 32 // max(1, itemsize))
    if rows <= min_rows:
        return rows                              # full extent: always legal
    target = _TARGET_TILE_BYTES // max(1, cols * itemsize)
    target = (target // min_rows) * min_rows
    target = max(min_rows, target)
    if rows <= target:
        return rows                              # full extent: always legal
    return target                                # cdiv grid handles remainder


def _pallas_identity_2d(x2d, tile_rows):
    """Lane-dense, row-tiled, pipelined, in/out-aliased identity copy."""
    rows, cols = x2d.shape
    itemsize = jnp.dtype(x2d.dtype).itemsize
    grid = (pl.cdiv(rows, tile_rows),)
    return pl.pallas_call(
        _copy_kernel,
        out_shape=jax.ShapeDtypeStruct((rows, cols), x2d.dtype),
        grid=grid,
        in_specs=[pl.BlockSpec((tile_rows, cols), lambda i: (i, 0))],
        out_specs=pl.BlockSpec((tile_rows, cols), lambda i: (i, 0)),
        # Output aliases the input buffer: no second HBM allocation and the
        # caller can donate the feature map.
        input_output_aliases={0: 0},
        compiler_params=pltpu.CompilerParams(
            # "parallel" lets the row axis shard across v7x's 2 TensorCores;
            # neutral on single-core v5e / v6e.
            dimension_semantics=("parallel",),
        ),
        cost_estimate=pl.CostEstimate(
            flops=0,
            transcendentals=0,
            bytes_accessed=2 * rows * cols * itemsize,
        ),
    )(x2d)


# ---------------------------------------------------------------------------
# Backbone — JAX/Pallas counterpart of the PyTorch nn.Module.
# ---------------------------------------------------------------------------
class Backbone:
    def __init__(self):
        # The abstract base class declares no parameters.  Concrete subclasses
        # would register conv weights here; nothing to initialize.
        self._out_features = []
        self._out_feature_channels = {}
        self._out_feature_strides = {}

    def forward(self, x: jax.Array) -> jax.Array:
        # Abstract forward => identity.  (A pure `return x` would be the true
        # optimum — zero HBM traffic — but the exercise mandates a kernel, so
        # we keep one aliased, pipelined, lane-dense copy.)
        shape = x.shape
        total = int(x.size)
        if total == 0:
            return x

        itemsize = jnp.dtype(x.dtype).itemsize
        last_dim = shape[-1] if len(shape) > 0 else 1
        cols = _pick_lane_cols(total, last_dim)
        rows = total // cols
        tile_rows = _pick_tile_rows(rows, cols, itemsize)

        y2d = _pallas_identity_2d(x.reshape(rows, cols), tile_rows)
        return y2d.reshape(shape)

    def __call__(self, x: jax.Array) -> jax.Array:
        return self.forward(x)

    @property
    def size_divisibility(self) -> int:
        return 0

    def output_shape(self):
        return {
            name: ShapeSpec(
                channels=self._out_feature_channels[name],
                stride=self._out_feature_strides[name],
            )
            for name in self._out_features
        }


# ---------------------------------------------------------------------------
# Demo / smoke test.
# ---------------------------------------------------------------------------
if __name__ == "__main__":
    key = jax.random.PRNGKey(0)
    # Small NCHW input consistent with a visual-backbone forward.
    x = jax.random.normal(key, (2, 4, 16, 16), dtype=jnp.float32)

    backbone = Backbone()
    y = jax.block_until_ready(backbone(x))

    # Abstract forward => identity semantics; sanity-check the round trip.
    assert y.shape == x.shape and y.dtype == x.dtype
    assert bool(jnp.allclose(y, x))
    # Glue paths exercised for parity with the PyTorch class.
    assert backbone.size_divisibility == 0
    assert backbone.output_shape() == {}

    print("KERNEL_OK")
</pallas_src>

<mosaic_0001>
module attributes {stable_mosaic.version = 11 : i64} {
  func.func @_copy_kernel(%arg0: i32, %arg1: memref<1x2048xf32, #tpu.memory_space<vmem>>, %arg2: memref<1x2048xf32, #tpu.memory_space<vmem>>) attributes {dimension_semantics = [#tpu.dimension_semantics<parallel>], iteration_bounds = array<i64: 1>, scalar_prefetch = 0 : i64, scratch_operands = 0 : i64, tpu.core_type = #tpu.core_type<tc>, window_params = [{transform_indices = @transform_0, window_bounds = array<i64: 1, 2048>}, {transform_indices = @transform_1, window_bounds = array<i64: 1, 2048>}]} {
    %c0 = arith.constant 0 : index
    %c0_0 = arith.constant 0 : index
    %0 = vector.load %arg1[%c0, %c0_0] : memref<1x2048xf32, #tpu.memory_space<vmem>>, vector<1x2048xf32>
    %c0_1 = arith.constant 0 : index
    %c0_2 = arith.constant 0 : index
    %1 = vector.load %arg2[%c0_1, %c0_2] : memref<1x2048xf32, #tpu.memory_space<vmem>>, vector<1x2048xf32>
    tpu.vector_store %arg2[%c0_1, %c0_2], %0 {strides = array<i32>} : memref<1x2048xf32, #tpu.memory_space<vmem>>, vector<1x2048xf32>,
    return
  }
  func.func @transform_0(%arg0: i32) -> (i32, i32) {
    %c0_i32 = arith.constant 0 : i32
    %c0_i32_0 = arith.constant 0 : i32
    return %arg0, %c0_i32 : i32, i32
  }
  func.func @transform_1(%arg0: i32) -> (i32, i32) {
    %c0_i32 = arith.constant 0 : i32
    %c0_i32_0 = arith.constant 0 : i32
    return %arg0, %c0_i32 : i32, i32
  }
}

</mosaic_0001>

<bundles_post_ra>
// kernel: tpu_custom_call.1
= control target key start
LH: loop header
LB: loop body
LE: loop exit
PB: predicated region body
PF: predicated region fallthrough
CT: control target
= control target key end

     0   :  { %6 = vsyncpa [#allocation3], 0  ;;  %s126_s0 = inlined_call_operand.hbm [shape: f32[1,2048], index: 0, kind: input, shape index: {}, may-alias: {0,1}]   ;;  %s127_s1 = inlined_call_operand.hbm [shape: f32[1,2048], index: 1, kind: output, shape index: {}, may-alias: {0,1}]  }
   0x1   :  { %7 = vsyncpa [#allocation4], 0  ;;  %s90_s6 = smov [#allocation2]   ;;  %s42_s10 = scalar_lea.hbm %s126_s0, 256 }
   0x2   :  { %s14_s7 = sshll.u32 %s90_s6, 4  ;;  %p43_p0 = scmp.ne.s32.totalorder %s126_s0, %s42_s10  ;;  %s15_s7 = int_to_ptr.vmem [resolvable:$true] %s14_s7 }
   0x3   :  { %p46_p1 = scmp.lt.u32.totalorder %s42_s10, %s126_s0 }
   0x5   :  { %p48_p2 = pnand %p46_p1, %p43_p0 }
   0x7   :  { %51 = shalt.err (!%p48_p2)
}
   0x8   :  { %s52_s15 = scalar_lea.vmem %s15_s7, 256  ;;  %p57_p4 = scmp.lt.s32.totalorder %s15_s7, %s15_s7 }
   0x9   :  { %p53_p3 = scmp.ne.s32.totalorder %s15_s7, %s52_s15  ;;  %p58_p5 = scmp.lt.s32.totalorder %s52_s15, %s52_s15 }
   0xb   :  { %p59_p6 = por %p58_p5, %p57_p4 }
   0xd   :  { %p60_p7 = pnand %p59_p6, %p53_p3 }
   0xf   :  { %63 = shalt.err (!%p60_p7)
}
  0x10   :  { %17 = dma.hbm_to_vmem [thread:$0]  %s126_s0, 256, %s15_s7, [#allocation3]  }
  0x11   :  { %86 = dma.done.wait [#allocation3], 256  }
  0x12   :  { %87 = vsyncadd [#allocation3], 4294967040  ;;  %s91_s18 = smov [#allocation5]   ;;  %v21_v0 = vld [vmem:[#allocation2] sm:$0xff]  ;;  %v22_v1 = vld [vmem:[#allocation2 + $0x8] sm:$0xff] }
  0x13   :  { %s31_s19 = sshll.u32 %s91_s18, 4  ;;  %23 = vst [vmem:[#allocation5] sm:$0xff] %v21_v0  ;;  %24 = vst [vmem:[#allocation5 + $0x8] sm:$0xff] %v22_v1  ;;  %s32_s19 = int_to_ptr.vmem [resolvable:$true] %s31_s19 }
  0x14   :  { %s64_s20 = scalar_lea.vmem %s32_s19, 256  ;;  %p69_p9 = scmp.lt.s32.totalorder %s32_s19, %s32_s19 }
  0x15   :  { %p65_p8 = scmp.ne.s32.totalorder %s32_s19, %s64_s20  ;;  %p70_p10 = scmp.lt.s32.totalorder %s64_s20, %s64_s20 }
  0x17   :  { %p71_p11 = por %p70_p10, %p69_p9 }
  0x19   :  { %p72_p12 = pnand %p71_p11, %p65_p8 }
  0x1b   :  { %75 = shalt.err (!%p72_p12)
}
  0x1c   :  { %s76_s0 = scalar_lea.hbm %s127_s1, 256 }
  0x1d   :  { %p77_p13 = scmp.ne.s32.totalorder %s127_s1, %s76_s0  ;;  %p80_p0 = scmp.lt.u32.totalorder %s76_s0, %s127_s1 }
  0x1f   :  { %p82_p1 = pnand %p80_p0, %p77_p13 }
  0x21   :  { %85 = shalt.err (!%p82_p1)
}
  0x22   :  { %34 = dma.vmem_to_hbm [thread:$0]  %s32_s19, 256, %s127_s1, [#allocation4]  }
  0x23   :  { %88 = dma.done.wait [#allocation4], 256  }
  0x24   :  { %89 = vsyncadd [#allocation4], 4294967040 }
  0x25   :  { %38 = vsyncpa [#allocation3], 1 }
  0x26   :  { %39 = vsyncpa [#allocation4], 1 }

</bundles_post_ra>
